<compile_context>
chip_gen: v7x
topology: tpu7x:2x2x1
jax: 0.10.0
libtpu: 0.0.40
codegen_flags: <defaults>
</compile_context>

<pallas_src>
import jax
import jax.numpy as jnp
from jax import lax
from jax.experimental import pallas as pl
from jax.experimental.pallas import tpu as pltpu


def _make_normalize_pad_kernel(mean_vals, inv_std_vals, *, h, h_pad, w, w_pad, th):
    """Build the per-row-tile normalize + zero-pad kernel.

    mean / 1/std are compile-time Python scalars -> per-channel splats, no
    tensor inputs.  Each output element is written exactly once.
    """
    c = len(mean_vals)
    pad_w = w_pad - w

    def kernel(x_ref, o_ref):
        x = x_ref[...]                                           # (1, c, th, w)
        # Per-channel scalar splats; c is tiny so the Python loop is unrolled.
        # Concatenation is along a leading (non-sublane/lane) axis -> cheap.
        norm = jnp.concatenate(
            [(x[:, ch:ch + 1] - mean_vals[ch]) * inv_std_vals[ch]
             for ch in range(c)],
            axis=1)                                              # (1, c, th, w)

        def store_interior(vals):
            # Single store of the real-image columns; full-width and unmasked
            # whenever w == w_pad (the common post-resize case).
            o_ref[:, :, :, :w] = vals.astype(o_ref.dtype)

        if h == h_pad:
            # No in-canvas pad rows.  Rows past h_pad in a ragged last tile are
            # dropped by Pallas' OOB-write masking, so no row mask is needed.
            store_interior(norm)
        else:
            row0 = pl.multiple_of(pl.program_id(1) * th, th)
            is_interior = row0 + th <= h

            @pl.when(is_interior)                    # tile fully inside image
            def _():
                store_interior(norm)

            @pl.when(jnp.logical_not(is_interior))   # boundary / all-pad tile
            def _():
                rows = row0 + lax.broadcasted_iota(jnp.int32, norm.shape, 2)
                store_interior(jnp.where(rows < h, norm, 0.0))

        if pad_w > 0:
            # Right zero strip of batch_images' zero canvas, written exactly once.
            o_ref[:, :, :, w:] = jnp.zeros((1, c, th, pad_w), o_ref.dtype)

    return kernel


def rcnn_transform_batch(images, image_mean, image_std, *, size_divisible=32,
                         row_block=256, out_dtype=None):
    """GeneralizedRCNNTransform normalize + batch(zero-pad) as one Pallas pass.

    images:     (N, C, H, W); all images share one post-resize (H, W).
    image_mean: length-C sequence of Python floats (compile-time constants).
    image_std:  length-C sequence of Python floats (compile-time constants).
    returns:    (N, C, H_pad, W_pad) with spatial dims rounded up to size_divisible.
    """
    n, c, h, w = images.shape
    assert len(image_mean) == c and len(image_std) == c
    h_pad = size_divisible * pl.cdiv(h, size_divisible)
    w_pad = size_divisible * pl.cdiv(w, size_divisible)
    out_dtype = images.dtype if out_dtype is None else out_dtype

    # H-tiling: row blocks are a multiple of 8 (sublane), no larger than the
    # source image (so every input DMA stays in-bounds) nor the padded canvas.
    # row_block=256 keeps (in + out) x double-buffer well under the 32 MiB
    # scoped-VMEM default even at R-CNN sizes (3x800x1344 f32 -> ~16.5 MiB),
    # which is safe on v7x's 64 MiB physical VMEM; on v5e/v6e a larger
    # row_block (512-1024, with a higher vmem_limit_bytes) amortizes the
    # ~0.35us per-grid-step overhead better.  W stays whole -> contiguous,
    # lane-dense DMA slabs and stores.
    # TODO(synk): images with fewer than 8 rows would need a staging pad first.
    assert h >= 8, "rcnn_transform_batch expects images with at least 8 rows"
    th = min(row_block, h_pad, (h // 8) * 8)
    nh = pl.cdiv(h_pad, th)
    last_in_tile = pl.cdiv(h, th) - 1   # all-pad row tiles re-use the last real block

    kernel = _make_normalize_pad_kernel(
        tuple(float(m) for m in image_mean),
        tuple(1.0 / float(s) for s in image_std),
        h=h, h_pad=h_pad, w=w, w_pad=w_pad, th=th)

    return pl.pallas_call(
        kernel,
        out_shape=jax.ShapeDtypeStruct((n, c, h_pad, w_pad), out_dtype),
        grid_spec=pltpu.PrefetchScalarGridSpec(
            num_scalar_prefetch=0,
            grid=(n, nh),                       # batch x row-tiles, all independent
            in_specs=[
                pl.BlockSpec(
                    (1, c, th, w),
                    # Clamp so all-pad row tiles reuse the last real block
                    # (Pallas skips the repeat DMA; the data is fully masked).
                    lambda i, j: (i, 0, jnp.minimum(j, last_in_tile), 0)),
            ],
            out_specs=pl.BlockSpec((1, c, th, w_pad), lambda i, j: (i, 0, j, 0)),
        ),
        compiler_params=pltpu.CompilerParams(
            # Both axes are embarrassingly parallel (megacore split on v7x).
            # Swap the row-tile axis to pltpu.CORE_PARALLEL if profiling shows
            # a single busy TensorCore at tiny batch sizes.
            dimension_semantics=("parallel", "parallel"),
            vmem_limit_bytes=32 * 1024 * 1024,  # > v5e's 16 MiB default, v7x-safe
        ),
    )(images)


class HeadRCNN:
    """JAX/Pallas port of torchdistill's HeadRCNN special module."""

    def __init__(self, image_mean=(0.485, 0.456, 0.406),
                 image_std=(0.229, 0.224, 0.225), size_divisible=32,
                 row_block=256, out_dtype=None):
        # Static prep hoisted to init: mean and the reciprocal of std are plain
        # Python constants baked into the kernel at trace time.
        self.image_mean = tuple(float(m) for m in image_mean)
        self.image_std = tuple(float(s) for s in image_std)
        self.size_divisible = size_divisible
        self.row_block = row_block          # per-generation tile knob
        self.out_dtype = out_dtype          # e.g. jnp.bfloat16 if `seq` runs bf16

    def transform(self, images, targets=None):
        # GeneralizedRCNNTransform: normalize -> resize -> batch (zero-pad to a
        # size_divisible canvas).  Normalize + batch are fused in one Pallas kernel.
        # TODO(synk): the bilinear min_size/max_size resize (and target box
        # rescale) has no clean Pallas equivalent here; images are assumed to
        # share one post-resize (H, W).
        batched = rcnn_transform_batch(
            images, self.image_mean, self.image_std,
            size_divisible=self.size_divisible,
            row_block=self.row_block, out_dtype=self.out_dtype)
        return batched, targets

    def seq(self, x):
        # TODO(synk): the redesigned R-CNN head (external backbone sub-sequence
        # built by redesign_model) is not part of this module; identity stand-in.
        return x

    def forward(self, images, targets=None):
        original_image_sizes = []
        for img in images:
            val = img.shape[-2:]
            assert len(val) == 2
            original_image_sizes.append((int(val[0]), int(val[1])))
        batched, targets = self.transform(images, targets)
        return self.seq(batched)


if __name__ == "__main__":
    # Small shapes consistent with the module: a batch of 2 RGB images, 16x16.
    key = jax.random.PRNGKey(0)
    n, c, h, w = 2, 3, 16, 16
    images = jax.random.normal(key, (n, c, h, w), jnp.float32)

    module = HeadRCNN()
    out = jax.block_until_ready(module.forward(images))

    # Reference: torchvision-style normalize + batch_images(size_divisible=32).
    mean = jnp.asarray(module.image_mean, jnp.float32).reshape(1, c, 1, 1)
    std = jnp.asarray(module.image_std, jnp.float32).reshape(1, c, 1, 1)
    hp = module.size_divisible * (-(-h // module.size_divisible))
    wp = module.size_divisible * (-(-w // module.size_divisible))
    ref = jnp.zeros((n, c, hp, wp), jnp.float32).at[:, :, :h, :w].set(
        (images - mean) / std)

    assert out.shape == ref.shape, f"shape mismatch: {out.shape} vs {ref.shape}"
    assert jnp.allclose(out, ref, atol=1e-5, rtol=1e-5), "mismatch vs reference"

    print("KERNEL_OK")
</pallas_src>

<mosaic_0001>
module attributes {stable_mosaic.version = 11 : i64} {
  func.func @kernel(%arg0: i32, %arg1: i32, %arg2: memref<1x3x16x16xf32, #tpu.memory_space<vmem>>, %arg3: memref<1x3x16x32xf32, #tpu.memory_space<vmem>>) attributes {dimension_semantics = [#tpu.dimension_semantics<parallel>, #tpu.dimension_semantics<parallel>], iteration_bounds = array<i64: 2, 2>, scalar_prefetch = 0 : i64, scratch_operands = 0 : i64, tpu.core_type = #tpu.core_type<tc>, window_params = [{transform_indices = @transform_0, window_bounds = array<i64: 1, 3, 16, 16>}, {transform_indices = @transform_1, window_bounds = array<i64: 1, 3, 16, 32>}]} {
    %c0 = arith.constant 0 : index
    %c0_0 = arith.constant 0 : index
    %c0_1 = arith.constant 0 : index
    %c0_2 = arith.constant 0 : index
    %0 = vector.load %arg2[%c0, %c0_0, %c0_1, %c0_2] : memref<1x3x16x16xf32, #tpu.memory_space<vmem>>, vector<1x3x16x16xf32>
    %1 = vector.extract_strided_slice %0 {offsets = [0, 0, 0, 0], sizes = [1, 1, 16, 16], strides = [1, 1, 1, 1]} : vector<1x3x16x16xf32> to vector<1x1x16x16xf32>
    %cst = arith.constant 4.850000e-01 : f32
    %2 = vector.broadcast %cst : f32 to vector<1x1x16x16xf32>
    %3 = arith.subf %1, %2 : vector<1x1x16x16xf32>
    %cst_3 = arith.constant 4.36681223 : f32
    %4 = vector.broadcast %cst_3 : f32 to vector<1x1x16x16xf32>
    %5 = arith.mulf %3, %4 : vector<1x1x16x16xf32>
    %6 = vector.extract_strided_slice %0 {offsets = [0, 1, 0, 0], sizes = [1, 1, 16, 16], strides = [1, 1, 1, 1]} : vector<1x3x16x16xf32> to vector<1x1x16x16xf32>
    %cst_4 = arith.constant 4.560000e-01 : f32
    %7 = vector.broadcast %cst_4 : f32 to vector<1x1x16x16xf32>
    %8 = arith.subf %6, %7 : vector<1x1x16x16xf32>
    %cst_5 = arith.constant 4.46428585 : f32
    %9 = vector.broadcast %cst_5 : f32 to vector<1x1x16x16xf32>
    %10 = arith.mulf %8, %9 : vector<1x1x16x16xf32>
    %11 = vector.extract_strided_slice %0 {offsets = [0, 2, 0, 0], sizes = [1, 1, 16, 16], strides = [1, 1, 1, 1]} : vector<1x3x16x16xf32> to vector<1x1x16x16xf32>
    %cst_6 = arith.constant 4.060000e-01 : f32
    %12 = vector.broadcast %cst_6 : f32 to vector<1x1x16x16xf32>
    %13 = arith.subf %11, %12 : vector<1x1x16x16xf32>
    %cst_7 = arith.constant 4.44444466 : f32
    %14 = vector.broadcast %cst_7 : f32 to vector<1x1x16x16xf32>
    %15 = arith.mulf %13, %14 : vector<1x1x16x16xf32>
    %16 = tpu.concatenate %5, %10, %15 in 1 : vector<1x1x16x16xf32>, vector<1x1x16x16xf32>, vector<1x1x16x16xf32> -> vector<1x3x16x16xf32>
    %c16_i32 = arith.constant 16 : i32
    %17 = arith.muli %arg1, %c16_i32 : i32
    %18 = tpu.assume_multiple %17, 16 : i32
    %c16_i32_8 = arith.constant 16 : i32
    %19 = arith.addi %18, %c16_i32_8 : i32
    %c16_i32_9 = arith.constant 16 : i32
    %20 = arith.cmpi sle, %19, %c16_i32_9 : i32
    %21 = arith.extui %20 : i1 to i32
    %c0_i32 = arith.constant 0 : i32
    %22 = arith.cmpi ne, %21, %c0_i32 : i32
    scf.if %22 {
      %c0_15 = arith.constant 0 : index
      %c0_16 = arith.constant 0 : index
      %c0_17 = arith.constant 0 : index
      %c0_18 = arith.constant 0 : index
      %28 = vector.load %arg3[%c0_15, %c0_16, %c0_17, %c0_18] : memref<1x3x16x32xf32, #tpu.memory_space<vmem>>, vector<1x3x16x16xf32>
      tpu.vector_store %arg3[%c0_15, %c0_16, %c0_17, %c0_18], %16 {strides = array<i32>} : memref<1x3x16x32xf32, #tpu.memory_space<vmem>>, vector<1x3x16x16xf32>,
    } else {
    }
    %true = arith.constant true
    %23 = arith.xori %20, %true : i1
    %24 = arith.extui %23 : i1 to i32
    %c0_i32_10 = arith.constant 0 : i32
    %25 = arith.cmpi ne, %24, %c0_i32_10 : i32
    scf.if %25 {
      %28 = tpu.iota {dimensions = array<i32: 2>} : vector<1x3x16x16xi32>
      %29 = vector.broadcast %18 : i32 to vector<1x3x16x16xi32>
      %30 = arith.addi %29, %28 : vector<1x3x16x16xi32>
      %c16_i32_15 = arith.constant 16 : i32
      %31 = vector.broadcast %c16_i32_15 : i32 to vector<1x3x16x16xi32>
      %32 = arith.cmpi slt, %30, %31 : vector<1x3x16x16xi32>
      %cst_16 = arith.constant 0.000000e+00 : f32
      %33 = vector.broadcast %cst_16 : f32 to vector<1x3x16x16xf32>
      %34 = arith.select %32, %16, %33 : vector<1x3x16x16xi1>, vector<1x3x16x16xf32>
      %c0_17 = arith.constant 0 : index
      %c0_18 = arith.constant 0 : index
      %c0_19 = arith.constant 0 : index
      %c0_20 = arith.constant 0 : index
      %35 = vector.load %arg3[%c0_17, %c0_18, %c0_19, %c0_20] : memref<1x3x16x32xf32, #tpu.memory_space<vmem>>, vector<1x3x16x16xf32>
      tpu.vector_store %arg3[%c0_17, %c0_18, %c0_19, %c0_20], %34 {strides = array<i32>} : memref<1x3x16x32xf32, #tpu.memory_space<vmem>>, vector<1x3x16x16xf32>,
    } else {
    }
    %cst_11 = arith.constant 0.000000e+00 : f32
    %26 = vector.broadcast %cst_11 : f32 to vector<1x3x16x16xf32>
    %c0_12 = arith.constant 0 : index
    %c0_13 = arith.constant 0 : index
    %c0_14 = arith.constant 0 : index
    %c16 = arith.constant 16 : index
    %27 = vector.load %arg3[%c0_12, %c0_13, %c0_14, %c16] : memref<1x3x16x32xf32, #tpu.memory_space<vmem>>, vector<1x3x16x16xf32>
    tpu.vector_store %arg3[%c0_12, %c0_13, %c0_14, %c16], %26 {strides = array<i32>} : memref<1x3x16x32xf32, #tpu.memory_space<vmem>>, vector<1x3x16x16xf32>,
    return
  }
  func.func @transform_0(%arg0: i32, %arg1: i32) -> (i32, i32, i32, i32) {
    %c0_i32 = arith.constant 0 : i32
    %0 = arith.minsi %arg1, %c0_i32 : i32
    %c0_i32_0 = arith.constant 0 : i32
    %c0_i32_1 = arith.constant 0 : i32
    %c0_i32_2 = arith.constant 0 : i32
    return %arg0, %c0_i32_0, %0, %c0_i32_1 : i32, i32, i32, i32
  }
  func.func @transform_1(%arg0: i32, %arg1: i32) -> (i32, i32, i32, i32) {
    %c0_i32 = arith.constant 0 : i32
    %c0_i32_0 = arith.constant 0 : i32
    %c0_i32_1 = arith.constant 0 : i32
    return %arg0, %c0_i32, %arg1, %c0_i32_0 : i32, i32, i32, i32
  }
}

</mosaic_0001>

<bundles_post_ra>
// kernel: tpu_custom_call.1
= control target key start
LH: loop header
LB: loop body
LE: loop exit
PB: predicated region body
PF: predicated region fallthrough
CT: control target
= control target key end

     0   :  { %6 = vsyncpa [#allocation3], 0  ;;  %s892_s0 = inlined_call_operand.hbm [shape: f32[2,3,16,16], index: 0, kind: input, shape index: {}]   ;;  %s893_s1 = inlined_call_operand.hbm [shape: f32[2,3,32,32], index: 1, kind: output, shape index: {}]  }
   0x1   :  { %8 = vsyncpa [#allocation3 + $0x1], 0 }
   0x2   :  { %9 = vsyncpa [#allocation4], 0 }
   0x3   :  { %11 = vsyncpa [#allocation4 + $0x1], 0  ;;  %s652_s6 = smov 0   ;;  %s654_s7 = smov 0  }
   0x4   :  { %s656_s8 = smov 0   ;;  %s658_s9 = smov 0  }
   0x5   :  { %s660_s10 = smov 0   ;;  %s662_s11 = smov 0  }
   0x6   :  { %s664_s12 = smov 0   ;;  %s666_s13 = smov 0  }
   0x7   :  { %s668_s14 = smov 0   ;;  %s670_s15 = smov 0  }
   0x8   :  { %s672_s16 = smov 0  }
   0x9 LB: > { %s361_s17 = sadd.s32 4294967295, %s629_s16   ;;  %s362_s18 = sadd.s32 4294967294, %s629_s16   ;;  %s629_s16 = sphi %s672_s16, %s17_s16   ;;  %s625_s15 = sphi %s670_s15, %s911_s15   ;;  %s621_s14 = sphi %s668_s14, %s910_s14   ;;  %s617_s13 = sphi %s666_s13, %s909_s13   ;;  %s613_s12 = sphi %s664_s12, %s908_s12   ;;  %s609_s11 = sphi %s662_s11, %s907_s11   ;;  %s605_s10 = sphi %s660_s10, %s906_s10   ;;  %s601_s9 = sphi %s658_s9, %s905_s9   ;;  %s597_s8 = sphi %s656_s8, %s904_s8   ;;  %s593_s7 = sphi %s654_s7, %s903_s7   ;;  %s589_s6 = sphi %s652_s6, %s902_s6  }
   0xa   : > { %s26_s19 = sadd.s32 1, %s621_s14  ;;  %s29_s20 = sadd.s32 1, %s625_s15 }
   0xb   : > { %p27_p0 = scmp.ge.s32.totalorder %s26_s19, 2  ;;  %s42_s21 = sadd.s32 1, %s609_s11 }
   0xc   : > { %p49_p1 = scmp.ne.s32.totalorder %s609_s11, %s605_s10  ;;  %p50_p3 = scmp.eq.s32.totalorder %s629_s16, 0 }
   0xd   : > { %s913_s19 = smov (%p27_p0, %s26_s19), 0  ;;  %s915_s20 = smov (!%p27_p0, %s29_s20), %s625_s15 }
   0xe   : > { %p31_p2 = scmp.ge.s32.totalorder %s915_s20, 2  ;;  %p55_p4 = scmp.ne.s32.totalorder %s605_s10, %s601_s9 }
   0xf   : > { %p721_p5 = por %p50_p3, %p49_p1  ;;  %p56_p6 = scmp.eq.s32.totalorder %s361_s17, 0 }
  0x10   : > { %s917_s20 = smov (%p31_p2, %s915_s20), 0  ;;  %s66_s24 = ssub.s32 %s621_s14, %s913_s19 }
  0x11   : > { %s37_s22 = ssub.s32 %s625_s15, %s917_s20  ;;  %p727_p8 = por %p56_p6, %p55_p4 }
  0x12   : > { %p40_p7 = scmp.eq.s32.totalorder %s37_s22, 0  ;;  %s67_s26 = sor.u32 %s66_s24, %s37_s22 }
  0x13   : > { %s70_s27 = sadd.s32 1, %s597_s8  ;;  %p68_p9 = scmp.eq.s32.totalorder %s67_s26, 0 }
  0x14   : > { %s733_s28 = scalar_select %p40_p7, %s609_s11, %s42_s21  }
  0x15   : > { %p80_p10 = scmp.ne.s32.totalorder %s597_s8, %s593_s7  ;;  %p81_p11 = scmp.eq.s32.totalorder %s361_s17, 3 }
  0x16   : > { %p86_p12 = scmp.ne.s32.totalorder %s593_s7, %s589_s6  ;;  %p87_p0 = scmp.eq.s32.totalorder %s362_s18, 3 }
  0x17   : > { %s740_s29 = scalar_select %p68_p9, %s597_s8, %s70_s27  }
  0x18   : > { %p742_p13 = por %p81_p11, %p80_p10  ;;  %p404_p1 = scmp.lt.s32.totalorder %s629_s16, 4 }
  0x19   : > { %p747_p2 = por %p87_p0, %p86_p12  ;;  %s107_s3 = sand.u32 1, %s609_s11  }
  0x1a   : > { %s897_s30 = scalar_select %p742_p13, 1, 0 }
  0x1b   : > { %s898_s2 = scalar_select %p747_p2, 1, 0 }
  0x1c   : > { %s381_s4 = smul.u32 48, %s107_s3  ;;  %p754_p3 = pnand %p404_p1, %p721_p5 }
  0x1d   : > { %s586_s21 = smul.u32 768, %s625_s15  ;;  %s766_s23 = scalar_lea.sflag [#allocation3], %s107_s3 }
  0x1e   : > { %s111_s9 = scalar_lea.vmem [#allocation2], %s381_s4  ;;  %p506_p5 = pneg %p754_p3 }
  0x1f   : > { %s122_s17 = sshll.u32 %s111_s9, 4  ;;  %s764_s24 = scalar_lea.hbm %s892_s0, %s586_s21  ;;  %s759_s17 = int_to_ptr.vmem [resolvable:$true] %s122_s17 }
  0x20   : > { %s504_s26 = scalar_lea.hbm %s764_s24, 768  ;;  %s509_s9 = scalar_lea.hbm %s892_s0, 1536 }
  0x21   : > { %p505_p4 = scmp.ne.s32.totalorder %s764_s24, %s504_s26  ;;  %p510_p9 = scmp.lt.u32.totalorder %s764_s24, %s892_s0 }
  0x22   : > { %p511_p10 = scmp.lt.u32.totalorder %s509_s9, %s504_s26  ;;  %p513_p12 = scmp.lt.u32.totalorder %s504_s26, %s764_s24 }
  0x23   : > { %p507_p6 = pnand %p506_p5, %p505_p4 }
  0x24   : > { %p512_p11 = por %p511_p10, %p510_p9 }
  0x25   : > { %p508_p7 = pneg %p507_p6 }
  0x26   : > { %p514_p0 = por %p513_p12, %p512_p11 }
  0x28   : > { %p515_p1 = pnand %p514_p0, %p508_p7 }
  0x2a   : > { %518 = shalt.err (!%p515_p1)
}
  0x2b   : > { %s519_s3 = scalar_lea.vmem %s759_s17, 768  ;;  %s631_s22 = smov [#allocation2]  }
  0x2c   : > { %p520_p4 = scmp.ne.s32.totalorder %s759_s17, %s519_s3  ;;  %s524_s27 = sshll.u32 %s631_s22, 4  ;;  %s525_s27 = int_to_ptr.vmem [resolvable:$false] %s524_s27 }
  0x2d   : > { %s526_s4 = scalar_lea.vmem %s525_s27, 1536  ;;  %p527_p13 = scmp.lt.s32.totalorder %s759_s17, %s525_s27 }
  0x2e   : > { %p522_p6 = pnand %p520_p4, %p506_p5  ;;  %p528_p9 = scmp.lt.s32.totalorder %s526_s4, %s519_s3 }
  0x30   : > { %p523_p2 = pneg %p522_p6  ;;  %p529_p10 = por %p528_p9, %p527_p13 }
  0x32   : > { %p530_p11 = pnand %p529_p10, %p523_p2 }
  0x34   : > { %533 = shalt.err (!%p530_p11)
}
  0x35   : > { %s632_s26 = smov 128   ;;  %s633_s9 = smov 8  }
  0x36   : > { %399 = dma.hbm_to_vmem [thread:$0]  (!%p754_p3), %s764_s24, 768, %s759_s17, %s766_s23, %s632_s26, %s632_s26, %s633_s9  }
  0x37   : > { %p367_p5 = scmp.ge.s32.totalorder %s629_s16, 1  ;;  %p130_p7 = scmp.lt.s32.totalorder %s629_s16, 5 }
  0x39   : > { %p131_p12 = pnand %p367_p5, %p130_p7 }
  0x3a   : > { %s136_s21 = sand.u32 (!%p131_p12), 1, %s605_s10  }
  0x3b   : > { %134 = sbr.rel (%p131_p12) target bundleno = 108 (0x6c), region = 24  ;;  %s137_s3 = scalar_lea.sflag (!%p131_p12), [#allocation3], %s136_s21 }
  0x3c   : > { %s383_s18 = smul.u32 (!%p131_p12), 48, %s136_s21 }
  0x3e   : > { %s140_s22 = scalar_lea.vmem (!%p131_p12), [#allocation2], %s383_s18 }
  0x42   : > { %579 = dma.done.wait (%p727_p8), %s137_s3, 768  }
  0x43   : > { %581 = vsyncadd (%p727_p8), %s137_s3, 4294966528  ;;  %s156_s5 = sand.u32 1, %s593_s7   ;;  %s374_s17 = sshll.u32 %s613_s12, 4  ;;  %v163_v0 = vld [vmem:[%s140_s22] sm:$0xff]  ;;  %v164_v1 = vld [vmem:[%s140_s22 + $0x8] sm:$0xff] }
  0x44   : > { %s384_s24 = smul.u32 48, %s156_s5  ;;  %s807_s23 = sadd.s32 16, %s374_s17  ;;  %v165_v2 = vld [vmem:[%s140_s22 + $0x10] sm:$0xff]  ;;  %v166_v3 = vld [vmem:[%s140_s22 + $0x18] sm:$0xff]  ;;  %v167_v4 = vld [vmem:[%s140_s22 + $0x20] sm:$0xff] }
  0x45   : > { %v168_v5 = vld [vmem:[%s140_s22 + $0x28] sm:$0xff]  ;;  %v368_v6 = vadd.f32 -0.485, %v163_v0  ;;  %v369_v7 = vadd.f32 -0.485, %v164_v1  ;;  %p375_p8 = scmp.gt.s32.totalorder %s807_s23, 16 }
  0x46   : > { %v370_v8 = vadd.f32 -0.456, %v165_v2  ;;  %v371_v9 = vadd.f32 -0.456, %v166_v3  ;;  %v372_v11 = vadd.f32 -0.406, %v167_v4 }
  0x47   : > { %v171_v10 = vmul.f32 4.366812, %v368_v6  ;;  %v373_v12 = vadd.f32 -0.406, %v168_v5  ;;  %v172_v13 = vmul.f32 4.366812, %v369_v7 }
  0x48   : > { %v175_v14 = vmul.f32 4.464286, %v370_v8  ;;  %v176_v15 = vmul.f32 4.464286, %v371_v9  ;;  %v179_v16 = vmul.f32 4.4444447, %v372_v11 }
  0x49   : > { %v180_v17 = vmul.f32 4.4444447, %v373_v12  ;;  %s809_s25 = scalar_lea.vmem [#allocation5], %s384_s24  ;;  %186 = sbr.rel (%p375_p8) target bundleno = 80 (0x50), region = 32  ;;  %vm187_vm0 = vcmask (!%p375_p8), 130048  }
  0x4a   : > { %188 = vst.msk [vmem:[%s809_s25] sm:$0xff] (!%p375_p8), %vm187_vm0, %v171_v10  ;;  %189 = vst.msk [vmem:[%s809_s25 + $0x8] sm:$0xff] (!%p375_p8), %vm187_vm0, %v172_v13 }
  0x4b   : > { %190 = vst.msk [vmem:[%s809_s25 + $0x10] sm:$0xff] (!%p375_p8), %vm187_vm0, %v175_v14  ;;  %191 = vst.msk [vmem:[%s809_s25 + $0x18] sm:$0xff] (!%p375_p8), %vm187_vm0, %v176_v15 }
  0x4c   : > { %192 = vst.msk [vmem:[%s809_s25 + $0x20] sm:$0xff] (!%p375_p8), %vm187_vm0, %v179_v16  ;;  %193 = vst.msk [vmem:[%s809_s25 + $0x28] sm:$0xff] (!%p375_p8), %vm187_vm0, %v180_v17 }
  0x50 PF: > { %p376_p13 = scmp.le.s32.totalorder %s807_s23, 16 }
  0x51   : > { %v198_v18 = vlaneseq (!%p376_p13)  ;;  %v201_v19 = vstv (!%p376_p13), %s374_s17  ;;  %vm212_vm1 = vcmask (!%p376_p13), 130048  }
  0x52   : > { %197 = sbr.rel (%p376_p13) target bundleno = 93 (0x5d), region = 36 }
  0x53   : > { %v199_v20 = vshrl.u32 (!%p376_p13), %v198_v18, 7 }
  0x55   : > { %v202_v21 = vadd.s32 (!%p376_p13), %v201_v19, %v199_v20  ;;  %v200_v22 = vadd.s32 (!%p376_p13), 8, %v199_v20 }
  0x57   : > { %vm204_vm2 = vcmp.lt.s32.totalorder (!%p376_p13), %v202_v21, 16  ;;  %v203_v23 = vadd.s32 (!%p376_p13), %v201_v19, %v200_v22 }
  0x58   : > { %v206_v24 = vsel (!%p376_p13), %vm204_vm2, %v171_v10, 0.0  ;;  %v208_v25 = vsel (!%p376_p13), %vm204_vm2, %v175_v14, 0.0  ;;  %v210_v26 = vsel (!%p376_p13), %vm204_vm2, %v179_v16, 0.0 }
  0x59   : > { %213 = vst.msk [vmem:[%s809_s25] sm:$0xff] %vm212_vm1, %v206_v24  ;;  %vm205_vm3 = vcmp.lt.s32.totalorder %v203_v23, 16  ;;  %215 = vst.msk [vmem:[%s809_s25 + $0x10] sm:$0xff] %vm212_vm1, %v208_v25 }
  0x5a   : > { %217 = vst.msk [vmem:[%s809_s25 + $0x20] sm:$0xff] %vm212_vm1, %v210_v26  ;;  %v207_v27 = vsel %vm205_vm3, %v172_v13, 0.0  ;;  %v209_v28 = vsel %vm205_vm3, %v176_v15, 0.0  ;;  %v211_v29 = vsel %vm205_vm3, %v180_v17, 0.0 }
  0x5b   : > { %214 = vst.msk [vmem:[%s809_s25 + $0x8] sm:$0xff] %vm212_vm1, %v207_v27  ;;  %216 = vst.msk [vmem:[%s809_s25 + $0x18] sm:$0xff] %vm212_vm1, %v209_v28 }
  0x5c   : > { %218 = vst.msk [vmem:[%s809_s25 + $0x28] sm:$0xff] %vm212_vm1, %v211_v29 }
  0x5d PF: > { %vm219_vm4 = vcmask 261248   ;;  %v634_v30 = vmov 0.0   ;;  %s227_s27 = scalar_lea.sflag [#allocation4], %s156_s5 }
  0x5e   : > { %220 = vst.msk [vmem:[%s809_s25] sm:$0xff] %vm219_vm4, %v634_v30  ;;  %221 = vst.msk [vmem:[%s809_s25 + $0x8] sm:$0xff] %vm219_vm4, %v634_v30 }
  0x5f   : > { %222 = vst.msk [vmem:[%s809_s25 + $0x10] sm:$0xff] %vm219_vm4, %v634_v30  ;;  %223 = vst.msk [vmem:[%s809_s25 + $0x18] sm:$0xff] %vm219_vm4, %v634_v30 }
  0x60   : > { %224 = vst.msk [vmem:[%s809_s25 + $0x20] sm:$0xff] %vm219_vm4, %v634_v30  ;;  %225 = vst.msk [vmem:[%s809_s25 + $0x28] sm:$0xff] %vm219_vm4, %v634_v30 }
  0x61   : > { %s377_s4 = sshll.u32 %s613_s12, 1  ;;  %s385_s26 = smul.u32 12, %s617_s13 }
  0x62   : > { %s258_s9 = sshll.u32 %s809_s25, 4  ;;  %s635_s3 = smov 256   ;;  %s259_s9 = int_to_ptr.vmem [resolvable:$true] %s258_s9 }
  0x63   : > { %s239_s21 = sadd.s32 %s385_s26, %s377_s4  ;;  %p900_p2 = scmp.ne.s32.totalorder %s897_s30, 0 }
  0x64   : > { %s378_s18 = sshll.u32 %s239_s21, 7  ;;  %s636_s24 = smov 512  }
  0x65   : > { %388 = sst [smem:[#allocation7]] (%p900_p2), %s635_s3  ;;  %s241_s17 = scalar_lea.hbm %s893_s1, %s378_s18 }
  0x66   : > { %389 = sst [smem:[#allocation7 + $0x1]] (%p900_p2), %s636_s24  ;;  %s637_s23 = smov 2  }
  0x67   : > { %390 = sst [smem:[#allocation7 + $0x2]] (%p900_p2), %s637_s23  ;;  %s638_s12 = smov 128  }
  0x68   : > { %391 = sst [smem:[#allocation7 + $0x3]] (%p900_p2), %s638_s12  ;;  %s639_s13 = smov 8  }
  0x69   : > { %392 = sst [smem:[#allocation7 + $0x4]] (%p900_p2), %s638_s12  ;;  %s640_s25 = smov [#allocation6]  }
  0x6a   : > { %393 = sst [smem:[#allocation7 + $0x5]] (%p900_p2), %s639_s13  ;;  %s641_s4 = smov 0  }
  0x6b   : > { %394 = dma.general (%p900_p2), %s259_s9, 768, %s241_s17, %s227_s27, %s640_s25, [#allocation7], %s641_s4, 0  }
  0x6c PF: > { %p405_p3 = scmp.ge.s32.totalorder %s629_s16, 2  ;;  %s286_s26 = sand.u32 1, %s589_s6  }
  0x6d   : > { %p901_p0 = scmp.ne.s32.totalorder %s898_s2, 0  ;;  %s287_s21 = scalar_lea.sflag [#allocation4], %s286_s26 }
  0x6f   : > { %p401_p1 = pnand %p405_p3, %p901_p0 }
  0x71   : > { %583 = dma.done.wait (!%p401_p1), %s287_s21, 768  }
  0x72   : > { %585 = vsyncadd (!%p401_p1), %s287_s21, 4294966528  ;;  %s17_s16 = sadd.s32 1, %s629_s16   ;;  %s902_s6 = smov %s593_s7 }
  0x73   : > { %p14_p4 = scmp.ge.s32.totalorder %s17_s16, 6   ;;  %s903_s7 = smov %s597_s8 }
  0x74   : > { %s904_s8 = smov %s740_s29  ;;  %s905_s9 = smov %s605_s10 }
  0x75   : > { %s906_s10 = smov %s609_s11  ;;  %s907_s11 = smov %s733_s28 }
  0x76   : > { %s908_s12 = smov %s621_s14  ;;  %s909_s13 = smov %s625_s15 }
  0x77   : > { %s910_s14 = smov %s913_s19  ;;  %s911_s15 = smov %s917_s20 }
  0x78   :  { %16 = sbr.rel (!%p14_p4) target bundleno = 9 (0x9), region = 82 }
  0x7f   :  { %292 = vsyncpa [#allocation3], 1 }
  0x80   :  { %294 = vsyncpa [#allocation3 + $0x1], 1 }
  0x81   :  { %295 = vsyncpa [#allocation4], 1 }
  0x82   :  { %297 = vsyncpa [#allocation4 + $0x1], 1 }

</bundles_post_ra>
